<compile_context>
chip_gen: v6e
topology: v6e:2x2x1
jax: 0.10.0
libtpu: 0.0.40
codegen_flags: <defaults>
</compile_context>

<pallas_src>
import functools

import jax
import jax.numpy as jnp
from jax.experimental import pallas as pl
from jax.experimental.pallas import tpu as pltpu

_LANE = 128
_BF16_SUBLANE = 16  # sublane alignment used for batch tiles (bf16 packing)


def _cdiv(a, b):
    return -(-a // b)


def _round_up(n, m):
    return _cdiv(n, m) * m


def _mlp_kernel(x_ref, yf_ref, imm_ref, w1_ref, b1_ref, w2_ref, b2_ref,
                out_ref, *, dx, dy):
    """Fused concat + 2-layer MLP.

    out = relu([x | yf | imm] @ W1 + b1) @ W2 + b2
    Concat is fused by dotting each input against the matching static
    row-slice of the single VMEM-resident W1 (no wrapper-side concat, no
    extra HBM pass). Dots run in bf16 on the MXU with f32 accumulation;
    all elementwise math stays f32 (v5e-safe).
    """
    w1 = w1_ref[...]  # (D_in, H_pad) f32, resident across the grid
    x = x_ref[...].astype(jnp.bfloat16)
    yf = yf_ref[...].astype(jnp.bfloat16)
    im = imm_ref[...].astype(jnp.bfloat16)
    # TODO(synk): collapse into a single K=D_in dot via an in-kernel lane
    # concat of (x, yf, im) to save two MXU weight-load sequences (modest win,
    # only visible at small/medium batch where the kernel isn't HBM-bound).
    h = jnp.dot(x, w1[:dx].astype(jnp.bfloat16),
                preferred_element_type=jnp.float32)
    h += jnp.dot(yf, w1[dx:dx + dy].astype(jnp.bfloat16),
                 preferred_element_type=jnp.float32)
    h += jnp.dot(im, w1[dx + dy:].astype(jnp.bfloat16),
                 preferred_element_type=jnp.float32)
    h = jnp.maximum(h + b1_ref[...], 0.0)              # bias + ReLU in f32
    o = jnp.dot(h.astype(jnp.bfloat16), w2_ref[...],
                preferred_element_type=jnp.float32) + b2_ref[...]
    out_ref[...] = o.astype(out_ref.dtype)             # (TB, out_size) store


def simple_lecture_densenet_forward(x, y_features, room_id, kparams, *,
                                    out_size, batch_tile=2048):
    """Flatten views, run the fused MLP kernel, strip batch padding."""
    B = x.shape[0]
    x_flat = x.reshape(B, -1)
    yf_flat = y_features.reshape(B, -1)
    imm_flat = room_id.reshape(B, -1)
    Dx, Dy, Di = x_flat.shape[1], yf_flat.shape[1], imm_flat.shape[1]
    D_in = Dx + Dy + Di

    w1, b1, w2, b2 = kparams["w1"], kparams["b1"], kparams["w2"], kparams["b2"]
    H_pad = w1.shape[1]
    H_log = kparams["hidden_logical"]
    O = w2.shape[1]
    assert O == out_size

    # Balanced batch tiling: <=16 padded rows per tile, >=2 grid steps when
    # B allows (so the parallel batch axis can use both v7x TensorCores),
    # tile rounded to 16 for bf16 sublane packing of the in-kernel casts.
    ALIGN = _BF16_SUBLANE
    if B > ALIGN:
        num_tiles = max(2, _cdiv(B, batch_tile))
    else:
        num_tiles = 1
    TB = _round_up(_cdiv(B, num_tiles), ALIGN)
    num_tiles = _cdiv(B, TB)
    B_pad = TB * num_tiles
    if B_pad != B:
        pad = B_pad - B
        x_flat = jnp.pad(x_flat, ((0, pad), (0, 0)))
        yf_flat = jnp.pad(yf_flat, ((0, pad), (0, 0)))
        imm_flat = jnp.pad(imm_flat, ((0, pad), (0, 0)))

    # Logical (unpadded) cost estimate — padded hidden cols are zero weights.
    flops = 2 * B * (D_in * H_log + H_log * O)
    bytes_accessed = (4 * B * (D_in + O)                 # f32 activations in/out
                      + 4 * D_in * H_log + 2 * H_log * O  # f32 W1, bf16 W2
                      + 4 * (H_log + O))                  # f32 biases

    kernel = functools.partial(_mlp_kernel, dx=Dx, dy=Dy)
    out = pl.pallas_call(
        kernel,
        out_shape=jax.ShapeDtypeStruct((B_pad, O), jnp.float32),
        grid=(num_tiles,),
        in_specs=[
            # batch-tiled activations (fused concat: three separate inputs,
            # block last dims equal the full array dims -> legal)
            pl.BlockSpec((TB, Dx), lambda i: (i, 0)),
            pl.BlockSpec((TB, Dy), lambda i: (i, 0)),
            pl.BlockSpec((TB, Di), lambda i: (i, 0)),
            # weights / biases: VMEM-resident across the whole grid
            pl.BlockSpec((D_in, H_pad), lambda i: (0, 0)),
            pl.BlockSpec((1, H_pad), lambda i: (0, 0)),
            pl.BlockSpec((H_pad, O), lambda i: (0, 0)),
            pl.BlockSpec((1, O), lambda i: (0, 0)),
        ],
        out_specs=pl.BlockSpec((TB, O), lambda i: (i, 0)),
        compiler_params=pltpu.CompilerParams(
            dimension_semantics=("parallel",)),
        cost_estimate=pl.CostEstimate(
            flops=flops, transcendentals=0, bytes_accessed=bytes_accessed),
    )(x_flat, yf_flat, imm_flat, w1, b1, w2, b2)

    return out[:B] if B_pad != B else out


def init_params(key, in_dim, hidden, out_dim):
    """Deterministic init mimicking nn.Linear default (U[-1/sqrt(fan_in), +]).
    Weights stored as [in, out] (transpose of PyTorch's [out, in])."""
    k1, k2, k3, k4 = jax.random.split(key, 4)
    bound1 = 1.0 / jnp.sqrt(jnp.float32(in_dim))
    bound2 = 1.0 / jnp.sqrt(jnp.float32(hidden))
    w1 = jax.random.uniform(k1, (in_dim, hidden), jnp.float32, -bound1, bound1)
    b1 = jax.random.uniform(k2, (1, hidden), jnp.float32, -bound1, bound1)
    w2 = jax.random.uniform(k3, (hidden, out_dim), jnp.float32, -bound2, bound2)
    b2 = jax.random.uniform(k4, (1, out_dim), jnp.float32, -bound2, bound2)
    return {"w1": w1, "b1": b1, "w2": w2, "b2": b2}


def prepare_kernel_params(params, lane=_LANE):
    """One-time prep.

    * Hidden dim padded to 128 so the first-layer MXU output and W2's K dim
      are lane-dense (a mathematical no-op: padded W1 cols / b1 entries are
      zero -> relu(0)=0, and the matching W2 rows are zero).
    * Output dim is NOT padded -> byte-minimal HBM writeback.
    * W2 stored in bf16 (MXU-native); W1 kept f32 so its static row-slices
      stay (8,128)-tile-aligned, cast to bf16 inside the kernel.
    """
    w1, b1, w2, b2 = params["w1"], params["b1"], params["w2"], params["b2"]
    H = w1.shape[1]
    H_pad = _round_up(H, lane)
    w1p = jnp.pad(w1, ((0, 0), (0, H_pad - H)))                      # f32
    b1p = jnp.pad(b1, ((0, 0), (0, H_pad - H)))                      # f32
    w2p = jnp.pad(w2, ((0, H_pad - H), (0, 0))).astype(jnp.bfloat16)  # bf16
    return {"w1": w1p, "b1": b1p, "w2": w2p, "b2": b2,
            "hidden_logical": H}


if __name__ == "__main__":
    # Hyperparameters (small, consistent with the module's forward;
    # no 'coursenumber' feature -> enc_size = 0).
    batch_size = 8
    x_size = 16
    y_features_size = 8
    immutable_size = 8
    hidden_size = 32          # == hidden_size[1] in the module
    output_size = 8           # == y_size
    in_dim = x_size + y_features_size + immutable_size

    key = jax.random.PRNGKey(0)
    kx, ky, kr, kp = jax.random.split(key, 4)

    x = jax.random.normal(kx, (batch_size, x_size), jnp.float32)
    y_features = jax.random.normal(ky, (batch_size, y_features_size), jnp.float32)
    room_id = jax.random.normal(kr, (batch_size, immutable_size), jnp.float32)

    params = init_params(kp, in_dim, hidden_size, output_size)
    kparams = prepare_kernel_params(params)

    pred = simple_lecture_densenet_forward(
        x, y_features, room_id, kparams, out_size=output_size)
    pred = jax.block_until_ready(pred)

    # Sanity check against plain-JAX f32 reference (unpadded logical params).
    inp = jnp.concatenate(
        [x.reshape(batch_size, -1),
         y_features.reshape(batch_size, -1),
         room_id.reshape(batch_size, -1)], axis=1)
    ref = jnp.maximum(inp @ params["w1"] + params["b1"], 0.0) @ params["w2"] + params["b2"]
    assert pred.shape == (batch_size, output_size)
    # bf16 MXU dots (f32 accumulate) -> loosened tolerance vs f32 reference.
    assert jnp.allclose(pred, ref, atol=5e-2, rtol=5e-2)

    print("KERNEL_OK")
</pallas_src>

<mosaic_0001>
module attributes {stable_mosaic.version = 11 : i64} {
  func.func @_mlp_kernel(%arg0: i32, %arg1: memref<16x16xf32, #tpu.memory_space<vmem>>, %arg2: memref<16x8xf32, #tpu.memory_space<vmem>>, %arg3: memref<16x8xf32, #tpu.memory_space<vmem>>, %arg4: memref<32x128xf32, #tpu.memory_space<vmem>>, %arg5: memref<1x128xf32, #tpu.memory_space<vmem>>, %arg6: memref<128x8xbf16, #tpu.memory_space<vmem>>, %arg7: memref<1x8xf32, #tpu.memory_space<vmem>>, %arg8: memref<16x8xf32, #tpu.memory_space<vmem>>) attributes {dimension_semantics = [#tpu.dimension_semantics<parallel>], iteration_bounds = array<i64: 1>, scalar_prefetch = 0 : i64, scratch_operands = 0 : i64, tpu.core_type = #tpu.core_type<tc>, window_params = [{transform_indices = @transform_0, window_bounds = array<i64: 16, 16>}, {transform_indices = @transform_1, window_bounds = array<i64: 16, 8>}, {transform_indices = @transform_2, window_bounds = array<i64: 16, 8>}, {pipeline_mode = #tpu.pipeline_mode<synchronous>, transform_indices = @transform_3, window_bounds = array<i64: 32, 128>}, {pipeline_mode = #tpu.pipeline_mode<synchronous>, transform_indices = @transform_4, window_bounds = array<i64: 1, 128>}, {pipeline_mode = #tpu.pipeline_mode<synchronous>, transform_indices = @transform_5, window_bounds = array<i64: 128, 8>}, {pipeline_mode = #tpu.pipeline_mode<synchronous>, transform_indices = @transform_6, window_bounds = array<i64: 1, 8>}, {transform_indices = @transform_7, window_bounds = array<i64: 16, 8>}]} {
    %c0 = arith.constant 0 : index
    %c0_0 = arith.constant 0 : index
    %0 = vector.load %arg4[%c0, %c0_0] : memref<32x128xf32, #tpu.memory_space<vmem>>, vector<32x128xf32>
    %c0_1 = arith.constant 0 : index
    %c0_2 = arith.constant 0 : index
    %1 = vector.load %arg1[%c0_1, %c0_2] : memref<16x16xf32, #tpu.memory_space<vmem>>, vector<16x16xf32>
    %2 = arith.truncf %1 : vector<16x16xf32> to vector<16x16xbf16>
    %c0_3 = arith.constant 0 : index
    %c0_4 = arith.constant 0 : index
    %3 = vector.load %arg2[%c0_3, %c0_4] : memref<16x8xf32, #tpu.memory_space<vmem>>, vector<16x8xf32>
    %4 = arith.truncf %3 : vector<16x8xf32> to vector<16x8xbf16>
    %c0_5 = arith.constant 0 : index
    %c0_6 = arith.constant 0 : index
    %5 = vector.load %arg3[%c0_5, %c0_6] : memref<16x8xf32, #tpu.memory_space<vmem>>, vector<16x8xf32>
    %6 = arith.truncf %5 : vector<16x8xf32> to vector<16x8xbf16>
    %7 = vector.extract_strided_slice %0 {offsets = [0, 0], sizes = [16, 128], strides = [1, 1]} : vector<32x128xf32> to vector<16x128xf32>
    %8 = arith.truncf %7 : vector<16x128xf32> to vector<16x128xbf16>
    %cst = arith.constant dense<0.000000e+00> : vector<16x128xf32>
    %9 = tpu.matmul %2, %8, %cst {dimension_numbers = #tpu.dot_dimension_numbers<[1], [0], [0], [1], [0, 0, 1, 1], [], []>} : vector<16x16xbf16>, vector<16x128xbf16>, vector<16x128xf32> -> vector<16x128xf32>
    %10 = vector.extract_strided_slice %0 {offsets = [16, 0], sizes = [8, 128], strides = [1, 1]} : vector<32x128xf32> to vector<8x128xf32>
    %11 = arith.truncf %10 : vector<8x128xf32> to vector<8x128xbf16>
    %cst_7 = arith.constant dense<0.000000e+00> : vector<16x128xf32>
    %12 = tpu.matmul %4, %11, %cst_7 {dimension_numbers = #tpu.dot_dimension_numbers<[1], [0], [0], [1], [0, 0, 1, 1], [], []>} : vector<16x8xbf16>, vector<8x128xbf16>, vector<16x128xf32> -> vector<16x128xf32>
    %13 = arith.addf %9, %12 : vector<16x128xf32>
    %14 = vector.extract_strided_slice %0 {offsets = [24, 0], sizes = [8, 128], strides = [1, 1]} : vector<32x128xf32> to vector<8x128xf32>
    %15 = arith.truncf %14 : vector<8x128xf32> to vector<8x128xbf16>
    %cst_8 = arith.constant dense<0.000000e+00> : vector<16x128xf32>
    %16 = tpu.matmul %6, %15, %cst_8 {dimension_numbers = #tpu.dot_dimension_numbers<[1], [0], [0], [1], [0, 0, 1, 1], [], []>} : vector<16x8xbf16>, vector<8x128xbf16>, vector<16x128xf32> -> vector<16x128xf32>
    %17 = arith.addf %13, %16 : vector<16x128xf32>
    %c0_9 = arith.constant 0 : index
    %c0_10 = arith.constant 0 : index
    %18 = vector.load %arg5[%c0_9, %c0_10] : memref<1x128xf32, #tpu.memory_space<vmem>>, vector<1x128xf32>
    %19 = vector.broadcast %18 : vector<1x128xf32> to vector<16x128xf32>
    %20 = arith.addf %17, %19 : vector<16x128xf32>
    %cst_11 = arith.constant 0.000000e+00 : f32
    %21 = vector.broadcast %cst_11 : f32 to vector<16x128xf32>
    %22 = arith.maximumf %20, %21 : vector<16x128xf32>
    %23 = arith.truncf %22 : vector<16x128xf32> to vector<16x128xbf16>
    %c0_12 = arith.constant 0 : index
    %c0_13 = arith.constant 0 : index
    %24 = vector.load %arg6[%c0_12, %c0_13] : memref<128x8xbf16, #tpu.memory_space<vmem>>, vector<128x8xbf16>
    %cst_14 = arith.constant dense<0.000000e+00> : vector<16x8xf32>
    %25 = tpu.matmul %23, %24, %cst_14 {dimension_numbers = #tpu.dot_dimension_numbers<[1], [0], [0], [1], [0, 0, 1, 1], [], []>} : vector<16x128xbf16>, vector<128x8xbf16>, vector<16x8xf32> -> vector<16x8xf32>
    %c0_15 = arith.constant 0 : index
    %c0_16 = arith.constant 0 : index
    %26 = vector.load %arg7[%c0_15, %c0_16] : memref<1x8xf32, #tpu.memory_space<vmem>>, vector<1x8xf32>
    %27 = vector.broadcast %26 : vector<1x8xf32> to vector<16x8xf32>
    %28 = arith.addf %25, %27 : vector<16x8xf32>
    %c0_17 = arith.constant 0 : index
    %c0_18 = arith.constant 0 : index
    %29 = vector.load %arg8[%c0_17, %c0_18] : memref<16x8xf32, #tpu.memory_space<vmem>>, vector<16x8xf32>
    tpu.vector_store %arg8[%c0_17, %c0_18], %28 {strides = array<i32>} : memref<16x8xf32, #tpu.memory_space<vmem>>, vector<16x8xf32>,
    return
  }
  func.func @transform_0(%arg0: i32) -> (i32, i32) {
    %c0_i32 = arith.constant 0 : i32
    %c0_i32_0 = arith.constant 0 : i32
    return %arg0, %c0_i32 : i32, i32
  }
  func.func @transform_1(%arg0: i32) -> (i32, i32) {
    %c0_i32 = arith.constant 0 : i32
    %c0_i32_0 = arith.constant 0 : i32
    return %arg0, %c0_i32 : i32, i32
  }
  func.func @transform_2(%arg0: i32) -> (i32, i32) {
    %c0_i32 = arith.constant 0 : i32
    %c0_i32_0 = arith.constant 0 : i32
    return %arg0, %c0_i32 : i32, i32
  }
  func.func @transform_3(%arg0: i32) -> (i32, i32) {
    %c0_i32 = arith.constant 0 : i32
    %c0_i32_0 = arith.constant 0 : i32
    %c0_i32_1 = arith.constant 0 : i32
    return %c0_i32, %c0_i32_0 : i32, i32
  }
  func.func @transform_4(%arg0: i32) -> (i32, i32) {
    %c0_i32 = arith.constant 0 : i32
    %c0_i32_0 = arith.constant 0 : i32
    %c0_i32_1 = arith.constant 0 : i32
    return %c0_i32, %c0_i32_0 : i32, i32
  }
  func.func @transform_5(%arg0: i32) -> (i32, i32) {
    %c0_i32 = arith.constant 0 : i32
    %c0_i32_0 = arith.constant 0 : i32
    %c0_i32_1 = arith.constant 0 : i32
    return %c0_i32, %c0_i32_0 : i32, i32
  }
  func.func @transform_6(%arg0: i32) -> (i32, i32) {
    %c0_i32 = arith.constant 0 : i32
    %c0_i32_0 = arith.constant 0 : i32
    %c0_i32_1 = arith.constant 0 : i32
    return %c0_i32, %c0_i32_0 : i32, i32
  }
  func.func @transform_7(%arg0: i32) -> (i32, i32) {
    %c0_i32 = arith.constant 0 : i32
    %c0_i32_0 = arith.constant 0 : i32
    return %arg0, %c0_i32 : i32, i32
  }
}

</mosaic_0001>

<bundles_post_ra>
// kernel: tpu_custom_call.1
= control target key start
LH: loop header
LB: loop body
LE: loop exit
PB: predicated region body
PF: predicated region fallthrough
CT: control target
= control target key end

     0   :  { %v392_v0 = vmov 0.0   ;;  %vm46_vm0 = vcmask 1043456   ;;  %vm393_vm1 = vmmov 0   ;;  %vm42_vm2 = vcmask 64512   ;;  %s510_s3 = inlined_call_operand.vmem [shape: f32[32,128], index: 3, kind: input, shape index: {}]   ;;  %s511_s1 = inlined_call_operand.vmem [shape: f32[16,8], index: 1, kind: input, shape index: {}]   ;;  %s512_s5 = inlined_call_operand.vmem [shape: bf16[128,8], index: 5, kind: input, shape index: {}]   ;;  %s513_s0 = inlined_call_operand.vmem [shape: f32[16,16], index: 0, kind: input, shape index: {}]   ;;  %s514_s2 = inlined_call_operand.vmem [shape: f32[16,8], index: 2, kind: input, shape index: {}]   ;;  %s515_s4 = inlined_call_operand.vmem [shape: f32[1,128], index: 4, kind: input, shape index: {}]   ;;  %s516_s6 = inlined_call_operand.vmem [shape: f32[1,8], index: 6, kind: input, shape index: {}]   ;;  %s517_s7 = inlined_call_operand.vmem [shape: f32[16,8], index: 7, kind: output, shape index: {}]  }
   0x1   :  { %344 = vmatprep.subr.bf16.mxu0 %v392_v0  ;;  %v29_v1 = vld [vmem:[%s510_s3 + $0x10] sm:$0xff]  ;;  %346 = vmatprep.mubr.msk.bf16.mxu0 %vm393_vm1, %v392_v0  ;;  %v34_v2 = vld [vmem:[%s511_s1] sm:$0xff]  ;;  %v35_v4 = vld [vmem:[%s511_s1 + $0x8] sm:$0xff]  ;;  %vm91_vm3 = vcmask 130048  }
   0x2   :  { %v41_v3 = vpack.c.bf16 %v29_v1, %v29_v1  ;;  %v27_v5 = vld [vmem:[%s510_s3] sm:$0xff]  ;;  %v28_v6 = vld [vmem:[%s510_s3 + $0x8] sm:$0xff]  ;;  %362 = vmatprep.subr.bf16.mxu1 %v392_v0  ;;  %378 = vmatprep.mubr.msk.bf16.mxu1 %vm393_vm1, %v392_v0  ;;  %v36_v8 = vpack.c.bf16 %v35_v4, %v34_v2  ;;  %v384_v9 = vld [vmem:[%s512_s5 + $0x38] sm:$0xff]  }
   0x3   :  { %v30_v10 = vld [vmem:[%s510_s3 + $0x18] sm:$0xff]  ;;  %v40_v11 = vpack.c.bf16 %v28_v6, %v27_v5  ;;  %363 = vmatpush3.bf16.msra.mxu1 %v384_v9  ;;  %v31_v12 = vld [vmem:[%s513_s0] sm:$0xff]  ;;  %v32_v13 = vld [vmem:[%s513_s0 + $0x8] sm:$0xff] }
   0x4   :  { %v48_v7 = vsel %vm46_vm0, %v41_v3, 0  ;;  %364 = vmatprep.subr.bf16.mxu1 %v392_v0  ;;  %v136_v14 = vpack.c.bf16 %v30_v10, %v30_v10  ;;  %v33_v15 = vpack.c.bf16 %v32_v13, %v31_v12  ;;  %v37_v17 = vld [vmem:[%s514_s2] sm:$0xff]  ;;  %v38_v18 = vld [vmem:[%s514_s2 + $0x8] sm:$0xff]  ;;  %v385_v20 = vld [vmem:[%s512_s5 + $0x30] sm:$0xff]  }
   0x5   :  { %345 = vmatpush3.bf16.msra.mxu0 %v48_v7  ;;  %v39_v19 = vpack.c.bf16 %v38_v18, %v37_v17  ;;  %v386_v21 = vld [vmem:[%s512_s5 + $0x28] sm:$0xff]   ;;  %v387_v22 = vld [vmem:[%s512_s5 + $0x20] sm:$0xff]   ;;  %v388_v23 = vld [vmem:[%s512_s5 + $0x18] sm:$0xff]  }
   0x6   :  { %350 = vmatprep.subr.bf16.mxu0 %v392_v0  ;;  %v141_v16 = vsel %vm46_vm0, %v136_v14, 0  ;;  %v389_v24 = vld [vmem:[%s512_s5 + $0x10] sm:$0xff]   ;;  %v390_v25 = vld [vmem:[%s512_s5 + $0x8] sm:$0xff]   ;;  %v391_v26 = vld [vmem:[%s512_s5] sm:$0xff]  }
   0x7   :  { %365 = vmatpush3.bf16.msra.mxu1 %v385_v20  ;;  %v319_v38 = vld [vmem:[%s515_s4] ss:$0 sm:$0xff] }
   0x8   :  { %347 = vmatmul.mubr.msk.bf16.vlgmr.msra.gmra.mxu0 %vm42_vm2, %v36_v8  ;;  %366 = vmatprep.subr.bf16.mxu1 %v392_v0  ;;  %v320_v49 = vld [vmem:[%s516_s6] ss:$0 sm:$0xff] }
   0x9   :  { %351 = vmatpush3.bf16.msra.mxu0 %v40_v11  ;;  %352 = vmatprep.mubr.msk.bf16.mxu0 %vm393_vm1, %v392_v0 }
   0xa   :  { %356 = vmatprep.subr.bf16.mxu0 %v392_v0 }
   0xb   :  { %367 = vmatpush3.bf16.msra.mxu1 %v386_v21 }
   0xc   :  { %368 = vmatprep.subr.bf16.mxu1 %v392_v0 }
   0xf   :  { %369 = vmatpush3.bf16.msra.mxu1 %v387_v22 }
  0x10   :  { %353 = vmatmul.mubr.msk.bf16.vlgmr.msra.gmra.mxu0 %vm91_vm3, %v33_v15  ;;  %370 = vmatprep.subr.bf16.mxu1 %v392_v0 }
  0x11   :  { %357 = vmatpush3.bf16.msra.mxu0 %v141_v16  ;;  %358 = vmatprep.mubr.msk.bf16.mxu0 %vm393_vm1, %v392_v0 }
  0x13   :  { %371 = vmatpush3.bf16.msra.mxu1 %v388_v23 }
  0x14   :  { %372 = vmatprep.subr.bf16.mxu1 %v392_v0 }
  0x17   :  { %373 = vmatpush3.bf16.msra.mxu1 %v389_v24 }
  0x18   :  { %359 = vmatmul.mubr.msk.bf16.vlgmr.msra.gmra.mxu0 %vm42_vm2, %v39_v19  ;;  %374 = vmatprep.subr.bf16.mxu1 %v392_v0 }
  0x1b   :  { %375 = vmatpush3.bf16.msra.mxu1 %v390_v25 }
  0x1c   :  { %376 = vmatprep.subr.bf16.mxu1 %v392_v0 }
  0x1f   :  { %377 = vmatpush3.bf16.msra.mxu1 %v391_v26 }
  0xc8   :  { %v84_v27 = vpop.f32.mrf.mxu0 }
  0xca   :  { %v348_v28 = vpop.f32.mrf.mxu0 }
  0xcc   :  { %v87_v29 = vpop.f32.mrf.mxu0 }
  0xce   :  { %v349_v30 = vpop.f32.mrf.mxu0 }
  0xd0   :  { %v129_v31 = vpop.f32.mrf.mxu0 }
  0xd1   :  { %v130_v35 = vadd.f32 %v129_v31, %v84_v27 }
  0xd2   :  { %v354_v32 = vpop.f32.mrf.mxu0 }
  0xd4   :  { %v132_v33 = vpop.f32.mrf.mxu0 }
  0xd5   :  { %v133_v40 = vadd.f32 %v132_v33, %v87_v29 }
  0xd6   :  { %v355_v34 = vpop.f32.mrf.mxu0 }
  0xd8   :  { %v177_v36 = vpop.f32.mrf.mxu0 }
  0xd9   :  { %v184_v37 = vadd.f32 %v177_v36, %v130_v35 }
  0xda   :  { %v360_v39 = vpop.f32.mrf.mxu0 }
  0xdb   :  { %v193_v42 = vadd.f32 %v319_v38, %v184_v37 }
  0xdc   :  { %v180_v41 = vpop.f32.mrf.mxu0 }
  0xdd   :  { %v185_v43 = vadd.f32 %v180_v41, %v133_v40  ;;  %v195_v46 = vmax.f32 %v193_v42, 0.0 }
  0xde   :  { %v361_v44 = vpop.f32.mrf.mxu0 }
  0xdf   :  { %v194_v45 = vadd.f32 %v319_v38, %v185_v43 }
  0xe1   :  { %v196_v47 = vmax.f32 %v194_v45, 0.0 }
  0xe3   :  { %v197_v48 = vpack.c.bf16 %v196_v47, %v195_v46 }
  0xe5   :  { %379 = vmatmul.mubr.bf16.vlgmr.msra.gmra.mxu1 %v197_v48 }
 0x1a5   :  { %v303_v50 = vpop.f32.mrf.mxu1 }
 0x1a6   :  { %v304_v51 = vadd.f32 %v320_v49, %v303_v50 }
 0x1a7   :  { %v380_v52 = vpop.f32.mrf.mxu1 }
 0x1a8   :  { %310 = vst.msk [vmem:[%s517_s7] sm:$0xff] %vm42_vm2, %v304_v51 }
 0x1a9   :  { %v306_v53 = vpop.f32.mrf.mxu1 }
 0x1aa   :  { %v307_v54 = vadd.f32 %v320_v49, %v306_v53 }
 0x1ab   :  { %v381_v55 = vpop.f32.mrf.mxu1 }
 0x1ac   :  { %311 = vst.msk [vmem:[%s517_s7 + $0x8] sm:$0xff] %vm42_vm2, %v307_v54 }

</bundles_post_ra>
